<compile_context>
chip_gen: v6e
topology: v6e:2x2x1
jax: 0.10.0
libtpu: 0.0.40
codegen_flags: <defaults>
</compile_context>

<pallas_src>
import functools

import jax
import jax.numpy as jnp
from jax.experimental import pallas as pl
from jax.experimental.pallas import tpu as pltpu


def _round_up(x, m):
    return (x + m - 1) // m * m


def _patch_embed_kernel(x_ref, w_ref, b_ref, o_ref):
    # x_ref: (tm, K) patch rows, w_ref: (K, N) weight, b_ref: (1, N) f32 bias.
    # Single MXU matmul per M tile, f32 accumulation, bias add in f32.
    acc = jnp.dot(x_ref[...], w_ref[...], preferred_element_type=jnp.float32)
    o_ref[...] = (acc + b_ref[...]).astype(o_ref.dtype)


def _pick_tm(M, cap):
    """M-tile size: multiple of 8, >=2 grid steps (v7x megacore), even steps."""
    if M <= 8:
        return M                      # full dim; trivially legal
    tm = min(cap, max(8, _round_up(pl.cdiv(M, 2), 8)))
    steps = pl.cdiv(M, tm)
    if steps > 1 and steps % 2 == 1:
        # Nudge toward an even step count so neither TensorCore gets a spare tile.
        tm2 = max(8, _round_up(pl.cdiv(M, steps + 1), 8))
        if pl.cdiv(M, tm2) % 2 == 0:
            tm = tm2
    return tm


@functools.partial(
    jax.jit,
    static_argnames=(
        "kernel_size", "stride", "padding", "compute_dtype", "out_dtype",
        "block_m_cap",
    ),
)
def patch_embed_forward(
    x, weight, bias, kernel_size, stride, padding=(0, 0),
    compute_dtype=jnp.bfloat16, out_dtype=None, block_m_cap=2048,
):
    """PatchEmbed.forward.

    x:      (B, C, H, W)            NCHW, as in PyTorch
    weight: (embed_dim, C, kh, kw)  nn.Conv2d weight layout
    bias:   (embed_dim,)
    returns (B, Hp, Wp, embed_dim)  == conv(x).permute(0, 2, 3, 1), in out_dtype
            (default out_dtype == compute_dtype, i.e. bf16).
    """
    assert tuple(kernel_size) == tuple(stride), "PatchEmbed uses kernel_size == stride"
    kh, kw = kernel_size
    ph, pw = padding
    out_dtype = compute_dtype if out_dtype is None else out_dtype

    if ph or pw:
        x = jnp.pad(x, ((0, 0), (0, 0), (ph, ph), (pw, pw)))

    B, C, H, W = x.shape
    N = weight.shape[0]                       # embed_dim
    Hp, Wp = H // kh, W // kw
    # Conv2d drops trailing rows/cols that don't fill a full window.
    x = x[:, :, : Hp * kh, : Wp * kw]

    # --- glue: non-overlapping patch extraction -> (M, K) ---
    # Cast first so any materialized patch intermediate is compute-dtype wide.
    xc = x.astype(compute_dtype)
    patches = xc.reshape(B, C, Hp, kh, Wp, kw)
    patches = jnp.transpose(patches, (0, 2, 4, 1, 3, 5))
    patches = patches.reshape(B * Hp * Wp, C * kh * kw)

    # Conv weight -> (K, N) dense weight; bias -> (1, N) f32.
    w2d = weight.reshape(N, C * kh * kw).T.astype(compute_dtype)
    b2d = bias.reshape(1, N).astype(jnp.float32)

    M, K = patches.shape                      # K left un-padded (full-K blocks)

    tm = _pick_tm(M, block_m_cap)
    grid = (pl.cdiv(M, tm),)

    in_b = jnp.dtype(compute_dtype).itemsize
    out_b = jnp.dtype(out_dtype).itemsize

    # Footprint-derived VMEM budget: double-buffered patch/out tiles + W/b
    # (default-double-buffered, but tiny) + 1.5x slack, clamped for v7x's 64 MiB.
    footprint = (2 * tm * K * in_b + 2 * tm * N * out_b
                 + 2 * (K * N * in_b + N * 4))
    vmem_limit = min(56 * 1024 * 1024,
                     max(16 * 1024 * 1024,
                         _round_up(int(footprint * 1.5) + (2 << 20), 1 << 20)))

    cost = pl.CostEstimate(
        flops=2 * M * N * K,
        transcendentals=0,
        bytes_accessed=M * K * in_b + K * N * in_b + N * 4 + M * N * out_b,
    )

    out = pl.pallas_call(
        _patch_embed_kernel,
        out_shape=jax.ShapeDtypeStruct((M, N), out_dtype),
        grid=grid,
        in_specs=[
            pl.BlockSpec((tm, K), lambda i: (i, 0)),   # patch rows: pipelined
            pl.BlockSpec((K, N), lambda i: (0, 0)),    # weight: VMEM-resident
            pl.BlockSpec((1, N), lambda i: (0, 0)),    # bias:   VMEM-resident
        ],
        out_specs=pl.BlockSpec((tm, N), lambda i: (i, 0)),
        compiler_params=pltpu.CompilerParams(
            dimension_semantics=("parallel",),          # shard M over v7x's 2 TCs
            allow_input_fusion=[True, False, False],    # fold patch gather into DMA
            vmem_limit_bytes=vmem_limit,
        ),
        cost_estimate=cost,
    )(patches, w2d, b2d)

    return out.reshape(B, Hp, Wp, N)


if __name__ == "__main__":
    # Small shapes consistent with the module's forward:
    # batch=2, in_chans=4, spatial=16, patch=(4,4), embed_dim=32
    B, C, H, W = 2, 4, 16, 16
    kh, kw = 4, 4
    embed_dim = 32

    key = jax.random.PRNGKey(0)
    kx, kwk, kbk = jax.random.split(key, 3)
    x = jax.random.normal(kx, (B, C, H, W), dtype=jnp.float32)
    weight = jax.random.normal(kwk, (embed_dim, C, kh, kw), dtype=jnp.float32) * 0.02
    bias = jax.random.normal(kbk, (embed_dim,), dtype=jnp.float32) * 0.02

    # Reference: XLA conv (NCHW, OIHW) then permute to NHWC, same as PyTorch.
    ref = jax.lax.conv_general_dilated(
        x, weight, window_strides=(kh, kw), padding="VALID",
        dimension_numbers=("NCHW", "OIHW", "NCHW"),
    ) + bias.reshape(1, embed_dim, 1, 1)
    ref = jnp.transpose(ref, (0, 2, 3, 1))

    # f32 compute + f32 output path: must match the conv reference tightly.
    out_f32 = patch_embed_forward(
        x, weight, bias, kernel_size=(kh, kw), stride=(kh, kw),
        compute_dtype=jnp.float32, out_dtype=jnp.float32,
    )
    out_f32 = jax.block_until_ready(out_f32)
    assert out_f32.shape == (B, H // kh, W // kw, embed_dim), out_f32.shape
    assert out_f32.dtype == jnp.float32
    assert jnp.allclose(out_f32, ref, atol=1e-4, rtol=1e-4), float(
        jnp.max(jnp.abs(out_f32 - ref)))

    # Default path: bf16 compute (f32 MXU accumulation) + bf16 output.
    out = patch_embed_forward(x, weight, bias, kernel_size=(kh, kw), stride=(kh, kw))
    out = jax.block_until_ready(out)
    assert out.shape == (B, H // kh, W // kw, embed_dim), out.shape
    assert out.dtype == jnp.bfloat16
    assert jnp.allclose(out.astype(jnp.float32), ref, atol=2e-2, rtol=2e-2), float(
        jnp.max(jnp.abs(out.astype(jnp.float32) - ref)))

    print("KERNEL_OK")
</pallas_src>

<mosaic_0001>
module attributes {stable_mosaic.version = 11 : i64} {
  func.func @_patch_embed_kernel(%arg0: i32, %arg1: memref<16x64xf32, #tpu.memory_space<vmem>>, %arg2: memref<64x32xf32, #tpu.memory_space<vmem>>, %arg3: memref<1x32xf32, #tpu.memory_space<vmem>>, %arg4: memref<16x32xf32, #tpu.memory_space<vmem>>) attributes {dimension_semantics = [#tpu.dimension_semantics<parallel>], iteration_bounds = array<i64: 2>, scalar_prefetch = 0 : i64, scratch_operands = 0 : i64, tpu.core_type = #tpu.core_type<tc>, window_params = [{transform_indices = @transform_0, window_bounds = array<i64: 16, 64>}, {pipeline_mode = #tpu.pipeline_mode<synchronous>, transform_indices = @transform_1, window_bounds = array<i64: 64, 32>}, {pipeline_mode = #tpu.pipeline_mode<synchronous>, transform_indices = @transform_2, window_bounds = array<i64: 1, 32>}, {transform_indices = @transform_3, window_bounds = array<i64: 16, 32>}]} {
    %c0 = arith.constant 0 : index
    %c0_0 = arith.constant 0 : index
    %0 = vector.load %arg1[%c0, %c0_0] : memref<16x64xf32, #tpu.memory_space<vmem>>, vector<16x64xf32>
    %c0_1 = arith.constant 0 : index
    %c0_2 = arith.constant 0 : index
    %1 = vector.load %arg2[%c0_1, %c0_2] : memref<64x32xf32, #tpu.memory_space<vmem>>, vector<64x32xf32>
    %cst = arith.constant dense<0.000000e+00> : vector<16x32xf32>
    %2 = tpu.matmul %0, %1, %cst {dimension_numbers = #tpu.dot_dimension_numbers<[1], [0], [0], [1], [0, 0, 1, 1], [], []>} : vector<16x64xf32>, vector<64x32xf32>, vector<16x32xf32> -> vector<16x32xf32>
    %c0_3 = arith.constant 0 : index
    %c0_4 = arith.constant 0 : index
    %3 = vector.load %arg3[%c0_3, %c0_4] : memref<1x32xf32, #tpu.memory_space<vmem>>, vector<1x32xf32>
    %4 = vector.broadcast %3 : vector<1x32xf32> to vector<16x32xf32>
    %5 = arith.addf %2, %4 : vector<16x32xf32>
    %c0_5 = arith.constant 0 : index
    %c0_6 = arith.constant 0 : index
    %6 = vector.load %arg4[%c0_5, %c0_6] : memref<16x32xf32, #tpu.memory_space<vmem>>, vector<16x32xf32>
    tpu.vector_store %arg4[%c0_5, %c0_6], %5 {strides = array<i32>} : memref<16x32xf32, #tpu.memory_space<vmem>>, vector<16x32xf32>,
    return
  }
  func.func @transform_0(%arg0: i32) -> (i32, i32) {
    %c0_i32 = arith.constant 0 : i32
    %c0_i32_0 = arith.constant 0 : i32
    return %arg0, %c0_i32 : i32, i32
  }
  func.func @transform_1(%arg0: i32) -> (i32, i32) {
    %c0_i32 = arith.constant 0 : i32
    %c0_i32_0 = arith.constant 0 : i32
    %c0_i32_1 = arith.constant 0 : i32
    return %c0_i32, %c0_i32_0 : i32, i32
  }
  func.func @transform_2(%arg0: i32) -> (i32, i32) {
    %c0_i32 = arith.constant 0 : i32
    %c0_i32_0 = arith.constant 0 : i32
    %c0_i32_1 = arith.constant 0 : i32
    return %c0_i32, %c0_i32_0 : i32, i32
  }
  func.func @transform_3(%arg0: i32) -> (i32, i32) {
    %c0_i32 = arith.constant 0 : i32
    %c0_i32_0 = arith.constant 0 : i32
    return %arg0, %c0_i32 : i32, i32
  }
}

</mosaic_0001>

<bundles_post_ra>
// kernel: patch_embed_forward.1
= control target key start
LH: loop header
LB: loop body
LE: loop exit
PB: predicated region body
PF: predicated region fallthrough
CT: control target
= control target key end

     0   :  { %8 = vsyncpa [#allocation3], 0  ;;  %s651_s0 = inlined_call_operand.vmem [shape: f32[32,64], index: 0, kind: input, shape index: {}]   ;;  %s652_s1 = inlined_call_operand.vmem [shape: f32[64,32], index: 1, kind: input, shape index: {}]   ;;  %s653_s2 = inlined_call_operand.vmem [shape: f32[1,32], index: 2, kind: input, shape index: {}]   ;;  %s654_s3 = inlined_call_operand.hbm [shape: f32[32,32], index: 3, kind: output, shape index: {}]  }
   0x1   :  { %10 = vsyncpa [#allocation3 + $0x1], 0  ;;  %s521_s12 = smov 0   ;;  %s523_s13 = smov 0  }
   0x2   :  { %s525_s14 = smov 0   ;;  %s527_s15 = smov 0  }
   0x3 LB: > { %s542_s16 = sadd.s32 4294967295, %s496_s15   ;;  %s350_s17 = sadd.s32 4294967294, %s496_s15   ;;  %s496_s15 = sphi %s527_s15, %s660_s15   ;;  %s492_s14 = sphi %s525_s14, %s659_s14   ;;  %s488_s13 = sphi %s523_s13, %s658_s13   ;;  %s484_s12 = sphi %s521_s12, %s657_s12  }
   0x4   : > { %s546_s18 = sadd.s32 1, %s496_s15   ;;  %s91_s19 = sadd.s32 1, %s492_s14 }
   0x5   : > { %s88_s20 = ssub.s32 %s496_s15, %s546_s18  ;;  %p101_p0 = scmp.ne.s32.totalorder %s492_s14, %s488_s13 }
   0x6   : > { %p89_p1 = scmp.eq.s32.totalorder %s88_s20, 0  ;;  %p102_p2 = scmp.eq.s32.totalorder %s542_s16, 1 }
   0x7   : > { %p107_p3 = scmp.ne.s32.totalorder %s488_s13, %s484_s12  ;;  %p108_p4 = scmp.eq.s32.totalorder %s350_s17, 1 }
   0x8   : > { %s557_s21 = scalar_select %p89_p1, %s492_s14, %s91_s19  }
   0x9   : > { %p559_p5 = por %p102_p2, %p101_p0  ;;  %p563_p6 = por %p108_p4, %p107_p3 }
   0xa   : > { %p353_p7 = scmp.ge.s32.totalorder %s496_s15, 1  ;;  %p141_p8 = scmp.lt.s32.totalorder %s496_s15, 3 }
   0xc   : > { %p142_p9 = pnand %p353_p7, %p141_p8 }
   0xd   : > { %s355_s28 = sshll.u32 (!%p142_p9), %s542_s16, 1  ;;  %s162_s27 = sand.u32 (!%p142_p9), 1, %s488_s13  }
   0xe   : > { %145 = sbr.rel (%p142_p9) target bundleno = 247 (0xf7), region = 32  ;;  %p166_p10 = scmp.lt.s32.totalorder (!%p142_p9), %s355_s28, 3 }
   0xf   : > { %s611_s10 = scalar_lea.sflag (!%p142_p9), [#allocation3], %s162_s27 }
  0x13   : > { %v181_v0 = vld [vmem:[%s652_s1 + $0x38] sm:$0xff]  ;;  %v180_v1 = vld [vmem:[%s652_s1 + $0x30] sm:$0xff]  ;;  %v179_v2 = vld [vmem:[%s652_s1 + $0x28] sm:$0xff]  ;;  %s662_s28 = smov (!%p166_p10, %s355_s28), 3  ;;  %vm189_vm0 = vcmask 523264   ;;  %vm271_vm1 = vcmask 261120  }
  0x14   : > { %376 = vmatprep.subr.mxu0 %v181_v0  ;;  %v178_v3 = vld [vmem:[%s652_s1 + $0x20] sm:$0xff]  ;;  %s356_s6 = sshll.u32 %s662_s28, 3  ;;  %v177_v4 = vld [vmem:[%s652_s1 + $0x18] sm:$0xff]  ;;  %v176_v6 = vld [vmem:[%s652_s1 + $0x10] sm:$0xff]  ;;  %s354_s28 = sshll.u32 %s162_s27, 4 }
  0x15   : > { %377 = vmatpush3.msra.mxu0 %v181_v0  ;;  %s169_s11 = scalar_lea.vmem %s651_s0, %s356_s6  ;;  %v175_v7 = vld [vmem:[%s652_s1 + $0x8] sm:$0xff]  ;;  %v174_v8 = vld [vmem:[%s652_s1] sm:$0xff]  ;;  %s164_s4 = scalar_lea.vmem [#allocation2], %s354_s28 }
  0x16   : > { %378 = vmatprep.subr.mxu0 %v180_v1  ;;  %v172_v5 = vld [vmem:[%s169_s11] sm:$0xff]  ;;  %v173_v9 = vld [vmem:[%s169_s11 + $0x8] sm:$0xff]  ;;  %s288_s5 = sshll.u32 %s164_s4, 4  ;;  %s365_s6 = sshll.u32 %s542_s16, 8  ;;  %s604_s5 = int_to_ptr.vmem [resolvable:$true] %s288_s5 }
  0x17   : > { %379 = vmatpush3.msra.mxu0 %v180_v1  ;;  %392 = vmatprep.mubr.msk.f32.mxu0 %vm189_vm0, %v172_v5  ;;  %v357_v10 = vld [vmem:[%s653_s2] ss:$0 sm:$0xff]  ;;  %s609_s9 = scalar_lea.hbm %s654_s3, %s365_s6  ;;  %s436_s16 = scalar_lea.vmem %s604_s5, 256 }
  0x18   : > { %380 = vmatprep.subr.mxu0 %v179_v2  ;;  %p437_p11 = scmp.ne.s32.totalorder %s604_s5, %s436_s16  ;;  %s498_s11 = smov [#allocation2]  }
  0x19   : > { %381 = vmatpush3.msra.mxu0 %v179_v2  ;;  %s440_s17 = sshll.u32 %s498_s11, 4  ;;  %s441_s17 = int_to_ptr.vmem [resolvable:$false] %s440_s17 }
  0x1a   : > { %382 = vmatprep.subr.mxu0 %v178_v3  ;;  %p438_p12 = pnand %p437_p11, %p559_p5  ;;  %s442_s19 = scalar_lea.vmem %s441_s17, 512 }
  0x1b   : > { %383 = vmatpush3.msra.mxu0 %v178_v3  ;;  %p443_p0 = scmp.lt.s32.totalorder %s604_s5, %s441_s17  ;;  %p444_p1 = scmp.lt.s32.totalorder %s442_s19, %s436_s16 }
  0x1c   : > { %384 = vmatprep.subr.mxu0 %v177_v4  ;;  %p439_p13 = pneg %p438_p12 }
  0x1d   : > { %385 = vmatpush3.msra.mxu0 %v177_v4  ;;  %p445_p2 = por %p444_p1, %p443_p0 }
  0x1e   : > { %386 = vmatprep.subr.mxu0 %v176_v6 }
  0x1f   : > { %387 = vmatpush3.msra.mxu0 %v176_v6  ;;  %p446_p3 = pnand %p445_p2, %p439_p13 }
  0x20   : > { %388 = vmatprep.subr.mxu0 %v175_v7 }
  0x21   : > { %389 = vmatpush3.msra.mxu0 %v175_v7 }
  0x22   : > { %390 = vmatprep.subr.mxu0 %v174_v8 }
  0x23   : > { %391 = vmatpush3.msra.mxu0 %v174_v8 }
  0x24   : > { %393 = vmatmul.mubr.msk.f32.vlgmr.msra.gmra.mxu0 %vm189_vm0, %v173_v9 }
  0xe4   : > { %v394_v11 = vpop.f32.mrf.mxu0 }
  0xe5   : > { %v268_v12 = vadd.f32 %v394_v11, %v357_v10 }
  0xe6   : > { %v262_v13 = vpop.f32.mrf.mxu0 }
  0xe7   : > { %273 = vst.msk [vmem:[%s164_s4 + $0x8] sm:$0xff] %vm271_vm1, %v268_v12  ;;  %v263_v14 = vadd.f32 %v357_v10, %v262_v13 }
  0xe9   : > { %272 = vst.msk [vmem:[%s164_s4] sm:$0xff] %vm271_vm1, %v263_v14 }
  0xea   : > { %449 = shalt.err (!%p446_p3)
}
  0xeb   : > { %s450_s20 = scalar_lea.hbm %s609_s9, 256  ;;  %s454_s26 = scalar_lea.hbm %s654_s3, 512 }
  0xec   : > { %p451_p4 = scmp.ne.s32.totalorder %s609_s9, %s450_s20  ;;  %p455_p9 = scmp.lt.s32.totalorder %s609_s9, %s654_s3 }
  0xed   : > { %p456_p10 = scmp.lt.s32.totalorder %s454_s26, %s450_s20 }
  0xee   : > { %p452_p7 = pnand %p451_p4, %p559_p5 }
  0xef   : > { %p457_p11 = por %p456_p10, %p455_p9 }
  0xf0   : > { %p453_p8 = pneg %p452_p7 }
  0xf2   : > { %p458_p12 = pnand %p457_p11, %p453_p8 }
  0xf4   : > { %461 = shalt.err (!%p458_p12)
}
  0xf5   : > { %s499_s29 = smov 128   ;;  %s500_s30 = smov 8  }
  0xf6   : > { %395 = dma.vmem_to_hbm [thread:$0]  (%p559_p5), %s604_s5, 256, %s609_s9, %s611_s10, %s499_s29, %s499_s29, %s500_s30  }
  0xf7 PF: > { %p401_p13 = scmp.ge.s32.totalorder %s496_s15, 2  ;;  %s303_s4 = sand.u32 1, %s484_s12  }
  0xf8   : > { %s304_s6 = scalar_lea.sflag [#allocation3], %s303_s4 }
  0xf9   : > { %p398_p0 = pnand %p401_p13, %p563_p6 }
  0xfb   : > { %p399_p1 = pneg %p398_p0 }
  0xfd   : > { %479 = dma.done.wait (%p399_p1), %s304_s6, 256  }
  0xfe   : > { %481 = vsyncadd (%p399_p1), %s304_s6, 4294967040  ;;  %p13_p2 = scmp.ge.s32.totalorder %s546_s18, 4   ;;  %s657_s12 = smov %s488_s13 }
  0xff   : > { %s658_s13 = smov %s492_s14  ;;  %s659_s14 = smov %s557_s21 }
 0x100   : > { %s660_s15 = smov %s546_s18  ;;  %15 = sbr.rel (!%p13_p2) target bundleno = 3 (0x3), region = 67 }
 0x105   :  { %309 = vsyncpa [#allocation3], 1 }
 0x106   :  { %311 = vsyncpa [#allocation3 + $0x1], 1 }

</bundles_post_ra>
